<compile_context>
chip_gen: v6e
topology: v6e:2x2x1
jax: 0.10.0
libtpu: 0.0.40
codegen_flags: <defaults>
</compile_context>

<pallas_src>
import functools
import math
from typing import Any, NamedTuple

import jax
import jax.numpy as jnp
from jax.experimental import pallas as pl
from jax.experimental.pallas import tpu as pltpu

_INV_SQRT2 = 0.7071067811865476  # 1/sqrt(2)


# ----------------------------------------------------------------------------
# Small helpers
# ----------------------------------------------------------------------------
def _round_up(x, m):
    return (x + m - 1) // m * m


def _cdiv(a, b):
    return (a + b - 1) // b


def _pad2(a, rows, cols):
    pr, pc = rows - a.shape[0], cols - a.shape[1]
    if pr == 0 and pc == 0:
        return a
    return jnp.pad(a, ((0, pr), (0, pc)))


def _gelu_f32(y, approx):
    if approx:
        # tanh-approx GELU runs on the EUP (separate VLIW slot) -> near-free
        # epilogue; numerics differ slightly from torch nn.GELU() default.
        return jax.nn.gelu(y, approximate=True)
    return 0.5 * y * (1.0 + jax.lax.erf(y * _INV_SQRT2))


def _vmem_budget_bytes():
    """Generation-aware VMEM budget: ~75% of physical VMEM, capped."""
    cap = 64 * 1024 * 1024  # conservative default = v7x physical per-TC VMEM
    try:
        cap = int(getattr(pltpu.get_tpu_info(), "vmem_capacity_bytes", cap))
    except Exception:
        pass
    return int(max(32 * 1024 * 1024, min(0.75 * cap, 112 * 1024 * 1024)))


def _single_buffer_supported():
    """True if pl.BlockSpec(..., pipeline_mode=pl.Buffered(1)) exists here."""
    if not hasattr(pl, "Buffered"):
        return False
    try:
        pl.BlockSpec((8, 128), lambda i: (0, 0), pipeline_mode=pl.Buffered(1))
        return True
    except Exception:
        return False


def _act_tile_bytes(tm, d_pad, x_itemsize):
    # Double-buffered in+out tiles plus ~4 live f32 (tm, d_pad) temporaries
    # (act / lhs / y / spill headroom) inside the kernel.
    return tm * (2 * 2 * d_pad * x_itemsize + 4 * d_pad * 4)


def _choose_tm(batch, d_pad, act_budget_bytes, x_itemsize):
    b8 = _round_up(batch, 8)
    per_row = 2 * 2 * d_pad * x_itemsize + 4 * d_pad * 4
    cap = max(8, (act_budget_bytes // max(per_row, 1)) // 8 * 8)
    tm = int(min(512, cap))
    if b8 <= tm:
        # Whole batch fits in one tile; still split into 2 tiles when possible
        # so the 'parallel' batch axis can shard across v7x's 2 TensorCores.
        if b8 >= 16:
            return max(8, _round_up(_cdiv(b8, 2), 8))
        return b8
    n = _cdiv(b8, tm)
    if n % 2 == 1 and n > 1:
        n += 1  # even tile count -> both TensorCores busy on v7x
    return max(8, _round_up(_cdiv(b8, n), 8))


# ----------------------------------------------------------------------------
# Pre-staged (padded / cast / stacked) parameters
# ----------------------------------------------------------------------------
class PreparedMLP(NamedTuple):
    w_stack: jax.Array   # (depth, d_pad, d_pad) in compute_dtype
    b_stack: jax.Array   # (depth, 1, d_pad) float32
    input_dim: int
    layer_dim: int
    d_pad: int
    depth: int
    compute_dtype: Any


def prepare_mlp_params(params, *, compute_dtype=jnp.bfloat16):
    """Pad to 128-multiples, cast to compute_dtype and stack — ONCE."""
    input_dim = params[0][0].shape[0]
    layer_dim = params[0][0].shape[1]
    depth = len(params)
    d_pad = _round_up(max(input_dim, layer_dim), 128)
    cdt = jnp.dtype(compute_dtype)

    ws, bs = [], []
    for w, b in params:
        wp = _pad2(w, d_pad, d_pad)
        if wp.dtype != cdt:
            wp = wp.astype(cdt)
        bp = _pad2(jnp.asarray(b, jnp.float32).reshape(1, -1), 1, d_pad)
        ws.append(wp)
        bs.append(bp)
    return PreparedMLP(jnp.stack(ws), jnp.stack(bs),
                       input_dim, layer_dim, d_pad, depth, cdt)


# ----------------------------------------------------------------------------
# Tier 1: fused kernel — whole weight stack resident in VMEM
# ----------------------------------------------------------------------------
def _fused_mlp_kernel(x_ref, w_ref, b_ref, o_ref, *, depth, compute_dtype,
                      approx_gelu):
    # x_ref: (TM, Dpad)  w_ref: (depth, Dpad, Dpad)  b_ref: (depth, 1, Dpad)
    act = x_ref[...].astype(compute_dtype)
    for l in range(depth):  # static depth -> unrolled
        y = jnp.dot(act, w_ref[l], preferred_element_type=jnp.float32)
        y = y + b_ref[l].astype(jnp.float32)          # f32 epilogue
        y = _gelu_f32(y, approx_gelu)
        act = y.astype(compute_dtype) if l + 1 < depth else y
    o_ref[...] = act.astype(o_ref.dtype)


def _mlp_fused(x, prep, *, tm, vmem_limit, single_buffer, approx_gelu=False):
    batch = x.shape[0]
    d_pad, depth = prep.d_pad, prep.depth
    b_pad = _round_up(batch, tm)
    xp = _pad2(x, b_pad, d_pad)

    if single_buffer:
        # Constant index_map -> block never changes; a single buffer suffices
        # and halves the resident weight VMEM.
        w_spec = pl.BlockSpec((depth, d_pad, d_pad), lambda i: (0, 0, 0),
                              pipeline_mode=pl.Buffered(1))
        b_spec = pl.BlockSpec((depth, 1, d_pad), lambda i: (0, 0, 0),
                              pipeline_mode=pl.Buffered(1))
    else:
        w_spec = pl.BlockSpec((depth, d_pad, d_pad), lambda i: (0, 0, 0))
        b_spec = pl.BlockSpec((depth, 1, d_pad), lambda i: (0, 0, 0))

    kernel = functools.partial(_fused_mlp_kernel, depth=depth,
                               compute_dtype=prep.compute_dtype,
                               approx_gelu=approx_gelu)
    out = pl.pallas_call(
        kernel,
        out_shape=jax.ShapeDtypeStruct((b_pad, d_pad), x.dtype),
        grid=(b_pad // tm,),
        in_specs=[pl.BlockSpec((tm, d_pad), lambda i: (i, 0)), w_spec, b_spec],
        out_specs=pl.BlockSpec((tm, d_pad), lambda i: (i, 0)),
        compiler_params=pltpu.CompilerParams(
            dimension_semantics=("parallel",),   # batch tiles shard across TCs
            vmem_limit_bytes=int(vmem_limit),
        ),
    )(xp, prep.w_stack, prep.b_stack)
    return out[:batch, :prep.layer_dim]


# ----------------------------------------------------------------------------
# Tier 2: weight-streaming kernel — activation stays in a VMEM scratch,
# one layer's weights resident (double-buffered) at a time.
# ----------------------------------------------------------------------------
def _stream_mlp_kernel(x_ref, w_ref, b_ref, o_ref, act_ref, *, compute_dtype,
                       approx_gelu):
    l = pl.program_id(1)

    @pl.when(l == 0)
    def _():
        act_ref[...] = x_ref[...].astype(jnp.float32)

    lhs = act_ref[...].astype(compute_dtype)
    y = jnp.dot(lhs, w_ref[0], preferred_element_type=jnp.float32)
    y = y + b_ref[0].astype(jnp.float32)
    act_ref[...] = _gelu_f32(y, approx_gelu)

    @pl.when(l == pl.num_programs(1) - 1)
    def _():
        o_ref[...] = act_ref[...].astype(o_ref.dtype)


def _mlp_streamed(x, prep, *, tm, vmem_limit, approx_gelu=False):
    batch = x.shape[0]
    d_pad, depth = prep.d_pad, prep.depth
    b_pad = _round_up(batch, tm)
    xp = _pad2(x, b_pad, d_pad)

    kernel = functools.partial(_stream_mlp_kernel,
                               compute_dtype=prep.compute_dtype,
                               approx_gelu=approx_gelu)
    out = pl.pallas_call(
        kernel,
        out_shape=jax.ShapeDtypeStruct((b_pad, d_pad), x.dtype),
        grid=(b_pad // tm, depth),
        in_specs=[
            pl.BlockSpec((tm, d_pad), lambda i, l: (i, 0)),
            pl.BlockSpec((1, d_pad, d_pad), lambda i, l: (l, 0, 0)),
            pl.BlockSpec((1, 1, d_pad), lambda i, l: (l, 0, 0)),
        ],
        out_specs=pl.BlockSpec((tm, d_pad), lambda i, l: (i, 0)),
        scratch_shapes=[pltpu.VMEM((tm, d_pad), jnp.float32)],
        compiler_params=pltpu.CompilerParams(
            dimension_semantics=("parallel", "arbitrary"),
            vmem_limit_bytes=int(vmem_limit),
        ),
    )(xp, prep.w_stack, prep.b_stack)
    return out[:batch, :prep.layer_dim]


# ----------------------------------------------------------------------------
# Tier 3 (last resort): single Linear+GELU, (M, N, K)-tiled, f32 accumulator
# ----------------------------------------------------------------------------
def _linear_gelu_tiled_kernel(x_ref, w_ref, b_ref, o_ref, acc_ref, *,
                              approx_gelu):
    k = pl.program_id(2)

    @pl.when(k == 0)
    def _():
        acc_ref[...] = jnp.zeros_like(acc_ref)

    acc_ref[...] += jnp.dot(x_ref[...], w_ref[...],
                            preferred_element_type=jnp.float32)

    @pl.when(k == pl.num_programs(2) - 1)
    def _():
        y = acc_ref[...] + b_ref[...].astype(jnp.float32)
        o_ref[...] = _gelu_f32(y, approx_gelu).astype(o_ref.dtype)


def linear_gelu_tiled(x, w, b, *, compute_dtype=jnp.bfloat16,
                      tm=None, tn=None, tk=None, vmem_limit=None,
                      approx_gelu=False):
    M, K = x.shape
    Kw, N = w.shape
    assert K == Kw
    out_dtype = x.dtype
    vmem_limit = vmem_limit or _vmem_budget_bytes()
    cdt = jnp.dtype(compute_dtype)

    # Don't over-pad small M to a full 256-row tile; keep tiles MXU-aligned.
    tm = tm or (_round_up(M, 8) if M <= 512 else 256)
    tn = tn or min(1024, _round_up(N, 128))
    tk = tk or min(1024, _round_up(K, 128))
    Mp, Np, Kp = _round_up(M, tm), _round_up(N, tn), _round_up(K, tk)

    xp = _pad2(x, Mp, Kp)
    wp = _pad2(w, Kp, Np)
    if xp.dtype != cdt:
        xp = xp.astype(cdt)
    if wp.dtype != cdt:
        wp = wp.astype(cdt)
    bp = _pad2(jnp.asarray(b, jnp.float32).reshape(1, -1), 1, Np)

    kernel = functools.partial(_linear_gelu_tiled_kernel,
                               approx_gelu=approx_gelu)
    out = pl.pallas_call(
        kernel,
        out_shape=jax.ShapeDtypeStruct((Mp, Np), out_dtype),
        grid=(Mp // tm, Np // tn, Kp // tk),
        in_specs=[
            pl.BlockSpec((tm, tk), lambda i, j, k: (i, k)),
            pl.BlockSpec((tk, tn), lambda i, j, k: (k, j)),
            pl.BlockSpec((1, tn), lambda i, j, k: (0, j)),
        ],
        out_specs=pl.BlockSpec((tm, tn), lambda i, j, k: (i, j)),
        scratch_shapes=[pltpu.VMEM((tm, tn), jnp.float32)],
        compiler_params=pltpu.CompilerParams(
            dimension_semantics=("parallel", "parallel", "arbitrary"),
            vmem_limit_bytes=int(vmem_limit),
        ),
    )(xp, wp, bp)
    return out[:M, :N]


# ----------------------------------------------------------------------------
# Public forward + params
# ----------------------------------------------------------------------------
def mlp_forward(x, params, *, compute_dtype=jnp.bfloat16, approx_gelu=False):
    """Forward pass.  `params` may be a PreparedMLP (preferred: pre-staged once)
    or a raw list of (w, b) pairs (padded/cast on the fly)."""
    prep = params if isinstance(params, PreparedMLP) else prepare_mlp_params(
        params, compute_dtype=compute_dtype)

    batch = x.shape[0]
    d_pad, depth = prep.d_pad, prep.depth
    budget = _vmem_budget_bytes()
    x_item = jnp.dtype(x.dtype).itemsize
    w_item = jnp.dtype(prep.compute_dtype).itemsize
    w_layer = d_pad * d_pad * w_item + d_pad * 4   # one layer's weight + f32 bias

    single_buf = _single_buffer_supported()
    w_buf = 1 if single_buf else 2                  # pipeline buffer count

    tm = _choose_tm(batch, d_pad, budget // 3, x_item)
    act_bytes = _act_tile_bytes(tm, d_pad, x_item)

    # Tier 1: whole weight stack resident in VMEM.
    if w_buf * depth * w_layer + act_bytes <= budget:
        try:
            return _mlp_fused(x, prep, tm=tm, vmem_limit=budget,
                              single_buffer=single_buf,
                              approx_gelu=approx_gelu)
        except Exception:
            # Buffered(1) not supported by this lowering -> retry with the
            # default double-buffered specs if they still fit.
            if single_buf and 2 * depth * w_layer + act_bytes <= budget:
                return _mlp_fused(x, prep, tm=tm, vmem_limit=budget,
                                  single_buffer=False,
                                  approx_gelu=approx_gelu)
            # else fall through to the streaming tier

    # Tier 2: stream one layer's weights at a time, activation in VMEM scratch.
    if 2 * w_layer + act_bytes + tm * d_pad * 4 <= budget:
        return _mlp_streamed(x, prep, tm=tm, vmem_limit=budget,
                             approx_gelu=approx_gelu)

    # Tier 3: per-layer (M, N, K)-tiled matmuls with HBM activation round-trips.
    out = _pad2(x, batch, d_pad)
    for l in range(depth):
        out = linear_gelu_tiled(out, prep.w_stack[l], prep.b_stack[l],
                                compute_dtype=prep.compute_dtype,
                                vmem_limit=budget, approx_gelu=approx_gelu)
    return out[:, :prep.layer_dim]


def init_mlp_params(key, input_dim, layer_dim, depth, dtype=jnp.float32):
    """Deterministic init mirroring nn.Linear default (uniform +/- 1/sqrt(fan_in))."""
    params = []
    in_dim = input_dim
    for _ in range(depth):
        key, kw, kb = jax.random.split(key, 3)
        bound = 1.0 / math.sqrt(in_dim)
        w = jax.random.uniform(kw, (in_dim, layer_dim), dtype, -bound, bound)
        b = jax.random.uniform(kb, (layer_dim,), dtype, -bound, bound)
        params.append((w, b))
        in_dim = layer_dim
    return params


def mlp_reference(x, params):
    """Plain-JAX reference for correctness checks."""
    for w, b in params:
        y = x.astype(jnp.float32) @ w.astype(jnp.float32) + b.astype(jnp.float32)
        x = _gelu_f32(y, False)
    return x


if __name__ == "__main__":
    key = jax.random.PRNGKey(0)
    batch, input_dim, layer_dim, depth = 16, 64, 128, 3

    k_in, k_params = jax.random.split(key)
    x = jax.random.normal(k_in, (batch, input_dim), jnp.float32)
    params = init_mlp_params(k_params, input_dim, layer_dim, depth)
    ref = mlp_reference(x, params)

    # 1) Default perf path: pre-staged bf16 weights, fused resident-weight kernel.
    prep_bf16 = prepare_mlp_params(params, compute_dtype=jnp.bfloat16)
    out = jax.block_until_ready(mlp_forward(x, prep_bf16))
    assert out.shape == (batch, layer_dim)
    assert jnp.allclose(out, ref, atol=1e-1, rtol=5e-2)

    # 2) Exact-f32 fused path (erf GELU, exact semantics of the torch module).
    prep_f32 = prepare_mlp_params(params, compute_dtype=jnp.float32)
    out_f32 = jax.block_until_ready(mlp_forward(x, prep_f32))
    assert jnp.allclose(out_f32, ref, atol=1e-5, rtol=1e-5)

    # 3) Weight-streaming kernel (middle tier for weight stacks > VMEM budget).
    out_stream = jax.block_until_ready(
        _mlp_streamed(x, prep_f32, tm=8, vmem_limit=_vmem_budget_bytes()))
    assert jnp.allclose(out_stream, ref, atol=1e-5, rtol=1e-5)

    # 4) Per-layer (M, N, K)-tiled last-resort kernel.
    out_tiled = x
    for w, b in params:
        out_tiled = linear_gelu_tiled(out_tiled, w, b, compute_dtype=jnp.float32)
    out_tiled = jax.block_until_ready(out_tiled)
    assert jnp.allclose(out_tiled, ref, atol=1e-5, rtol=1e-5)

    # 5) tanh-approx GELU epilogue variant compiles & runs (numerics differ).
    out_tanh = jax.block_until_ready(mlp_forward(x, prep_bf16, approx_gelu=True))
    assert out_tanh.shape == (batch, layer_dim)
    assert bool(jnp.all(jnp.isfinite(out_tanh)))

    print("KERNEL_OK")
</pallas_src>

<mosaic_0001>
module attributes {stable_mosaic.version = 11 : i64} {
  func.func @_fused_mlp_kernel(%arg0: i32, %arg1: memref<8x128xf32, #tpu.memory_space<vmem>>, %arg2: memref<3x128x128xbf16, #tpu.memory_space<vmem>>, %arg3: memref<3x1x128xf32, #tpu.memory_space<vmem>>, %arg4: memref<8x128xf32, #tpu.memory_space<vmem>>) attributes {dimension_semantics = [#tpu.dimension_semantics<parallel>], iteration_bounds = array<i64: 2>, scalar_prefetch = 0 : i64, scratch_operands = 0 : i64, tpu.core_type = #tpu.core_type<tc>, window_params = [{transform_indices = @transform_0, window_bounds = array<i64: 8, 128>}, {pipeline_mode = #tpu.pipeline_mode<synchronous>, transform_indices = @transform_1, window_bounds = array<i64: 3, 128, 128>}, {pipeline_mode = #tpu.pipeline_mode<synchronous>, transform_indices = @transform_2, window_bounds = array<i64: 3, 1, 128>}, {transform_indices = @transform_3, window_bounds = array<i64: 8, 128>}]} {
    %c0 = arith.constant 0 : index
    %c0_0 = arith.constant 0 : index
    %0 = vector.load %arg1[%c0, %c0_0] : memref<8x128xf32, #tpu.memory_space<vmem>>, vector<8x128xf32>
    %1 = arith.truncf %0 : vector<8x128xf32> to vector<8x128xbf16>
    %c0_1 = arith.constant 0 : index
    %c0_2 = arith.constant 0 : index
    %c0_3 = arith.constant 0 : index
    %2 = vector.load %arg2[%c0_1, %c0_2, %c0_3] : memref<3x128x128xbf16, #tpu.memory_space<vmem>>, vector<1x128x128xbf16>
    %3 = vector.shape_cast %2 : vector<1x128x128xbf16> to vector<128x128xbf16>
    %cst = arith.constant dense<0.000000e+00> : vector<8x128xf32>
    %4 = tpu.matmul %1, %3, %cst {dimension_numbers = #tpu.dot_dimension_numbers<[1], [0], [0], [1], [0, 0, 1, 1], [], []>} : vector<8x128xbf16>, vector<128x128xbf16>, vector<8x128xf32> -> vector<8x128xf32>
    %c0_4 = arith.constant 0 : index
    %c0_5 = arith.constant 0 : index
    %c0_6 = arith.constant 0 : index
    %5 = vector.load %arg3[%c0_4, %c0_5, %c0_6] : memref<3x1x128xf32, #tpu.memory_space<vmem>>, vector<1x1x128xf32>
    %6 = vector.shape_cast %5 : vector<1x1x128xf32> to vector<1x128xf32>
    %7 = vector.broadcast %6 : vector<1x128xf32> to vector<8x128xf32>
    %8 = arith.addf %4, %7 : vector<8x128xf32>
    %cst_7 = arith.constant 5.000000e-01 : f32
    %9 = vector.broadcast %cst_7 : f32 to vector<8x128xf32>
    %10 = arith.mulf %9, %8 : vector<8x128xf32>
    %cst_8 = arith.constant 0.707106769 : f32
    %11 = vector.broadcast %cst_8 : f32 to vector<8x128xf32>
    %12 = arith.mulf %8, %11 : vector<8x128xf32>
    %13 = math.erf %12 : vector<8x128xf32>
    %cst_9 = arith.constant 1.000000e+00 : f32
    %14 = vector.broadcast %cst_9 : f32 to vector<8x128xf32>
    %15 = arith.addf %14, %13 : vector<8x128xf32>
    %16 = arith.mulf %10, %15 : vector<8x128xf32>
    %17 = arith.truncf %16 : vector<8x128xf32> to vector<8x128xbf16>
    %c1 = arith.constant 1 : index
    %c0_10 = arith.constant 0 : index
    %c0_11 = arith.constant 0 : index
    %18 = vector.load %arg2[%c1, %c0_10, %c0_11] : memref<3x128x128xbf16, #tpu.memory_space<vmem>>, vector<1x128x128xbf16>
    %19 = vector.shape_cast %18 : vector<1x128x128xbf16> to vector<128x128xbf16>
    %cst_12 = arith.constant dense<0.000000e+00> : vector<8x128xf32>
    %20 = tpu.matmul %17, %19, %cst_12 {dimension_numbers = #tpu.dot_dimension_numbers<[1], [0], [0], [1], [0, 0, 1, 1], [], []>} : vector<8x128xbf16>, vector<128x128xbf16>, vector<8x128xf32> -> vector<8x128xf32>
    %c1_13 = arith.constant 1 : index
    %c0_14 = arith.constant 0 : index
    %c0_15 = arith.constant 0 : index
    %21 = vector.load %arg3[%c1_13, %c0_14, %c0_15] : memref<3x1x128xf32, #tpu.memory_space<vmem>>, vector<1x1x128xf32>
    %22 = vector.shape_cast %21 : vector<1x1x128xf32> to vector<1x128xf32>
    %23 = vector.broadcast %22 : vector<1x128xf32> to vector<8x128xf32>
    %24 = arith.addf %20, %23 : vector<8x128xf32>
    %cst_16 = arith.constant 5.000000e-01 : f32
    %25 = vector.broadcast %cst_16 : f32 to vector<8x128xf32>
    %26 = arith.mulf %25, %24 : vector<8x128xf32>
    %cst_17 = arith.constant 0.707106769 : f32
    %27 = vector.broadcast %cst_17 : f32 to vector<8x128xf32>
    %28 = arith.mulf %24, %27 : vector<8x128xf32>
    %29 = math.erf %28 : vector<8x128xf32>
    %cst_18 = arith.constant 1.000000e+00 : f32
    %30 = vector.broadcast %cst_18 : f32 to vector<8x128xf32>
    %31 = arith.addf %30, %29 : vector<8x128xf32>
    %32 = arith.mulf %26, %31 : vector<8x128xf32>
    %33 = arith.truncf %32 : vector<8x128xf32> to vector<8x128xbf16>
    %c2 = arith.constant 2 : index
    %c0_19 = arith.constant 0 : index
    %c0_20 = arith.constant 0 : index
    %34 = vector.load %arg2[%c2, %c0_19, %c0_20] : memref<3x128x128xbf16, #tpu.memory_space<vmem>>, vector<1x128x128xbf16>
    %35 = vector.shape_cast %34 : vector<1x128x128xbf16> to vector<128x128xbf16>
    %cst_21 = arith.constant dense<0.000000e+00> : vector<8x128xf32>
    %36 = tpu.matmul %33, %35, %cst_21 {dimension_numbers = #tpu.dot_dimension_numbers<[1], [0], [0], [1], [0, 0, 1, 1], [], []>} : vector<8x128xbf16>, vector<128x128xbf16>, vector<8x128xf32> -> vector<8x128xf32>
    %c2_22 = arith.constant 2 : index
    %c0_23 = arith.constant 0 : index
    %c0_24 = arith.constant 0 : index
    %37 = vector.load %arg3[%c2_22, %c0_23, %c0_24] : memref<3x1x128xf32, #tpu.memory_space<vmem>>, vector<1x1x128xf32>
    %38 = vector.shape_cast %37 : vector<1x1x128xf32> to vector<1x128xf32>
    %39 = vector.broadcast %38 : vector<1x128xf32> to vector<8x128xf32>
    %40 = arith.addf %36, %39 : vector<8x128xf32>
    %cst_25 = arith.constant 5.000000e-01 : f32
    %41 = vector.broadcast %cst_25 : f32 to vector<8x128xf32>
    %42 = arith.mulf %41, %40 : vector<8x128xf32>
    %cst_26 = arith.constant 0.707106769 : f32
    %43 = vector.broadcast %cst_26 : f32 to vector<8x128xf32>
    %44 = arith.mulf %40, %43 : vector<8x128xf32>
    %45 = math.erf %44 : vector<8x128xf32>
    %cst_27 = arith.constant 1.000000e+00 : f32
    %46 = vector.broadcast %cst_27 : f32 to vector<8x128xf32>
    %47 = arith.addf %46, %45 : vector<8x128xf32>
    %48 = arith.mulf %42, %47 : vector<8x128xf32>
    %c0_28 = arith.constant 0 : index
    %c0_29 = arith.constant 0 : index
    %49 = vector.load %arg4[%c0_28, %c0_29] : memref<8x128xf32, #tpu.memory_space<vmem>>, vector<8x128xf32>
    tpu.vector_store %arg4[%c0_28, %c0_29], %48 {strides = array<i32>} : memref<8x128xf32, #tpu.memory_space<vmem>>, vector<8x128xf32>,
    return
  }
  func.func @transform_0(%arg0: i32) -> (i32, i32) {
    %c0_i32 = arith.constant 0 : i32
    %c0_i32_0 = arith.constant 0 : i32
    return %arg0, %c0_i32 : i32, i32
  }
  func.func @transform_1(%arg0: i32) -> (i32, i32, i32) {
    %c0_i32 = arith.constant 0 : i32
    %c0_i32_0 = arith.constant 0 : i32
    %c0_i32_1 = arith.constant 0 : i32
    %c0_i32_2 = arith.constant 0 : i32
    return %c0_i32, %c0_i32_0, %c0_i32_1 : i32, i32, i32
  }
  func.func @transform_2(%arg0: i32) -> (i32, i32, i32) {
    %c0_i32 = arith.constant 0 : i32
    %c0_i32_0 = arith.constant 0 : i32
    %c0_i32_1 = arith.constant 0 : i32
    %c0_i32_2 = arith.constant 0 : i32
    return %c0_i32, %c0_i32_0, %c0_i32_1 : i32, i32, i32
  }
  func.func @transform_3(%arg0: i32) -> (i32, i32) {
    %c0_i32 = arith.constant 0 : i32
    %c0_i32_0 = arith.constant 0 : i32
    return %arg0, %c0_i32 : i32, i32
  }
}

module attributes {stable_mosaic.version = 11 : i64} {
  func.func @_fused_mlp_kernel(%arg0: i32, %arg1: memref<8x128xf32, #tpu.memory_space<vmem>>, %arg2: memref<3x128x128xbf16, #tpu.memory_space<vmem>>, %arg3: memref<3x1x128xf32, #tpu.memory_space<vmem>>, %arg4: memref<8x128xf32, #tpu.memory_space<vmem>>) attributes {dimension_semantics = [#tpu.dimension_semantics<parallel>], iteration_bounds = array<i64: 2>, scalar_prefetch = 0 : i64, scratch_operands = 0 : i64, tpu.core_type = #tpu.core_type<tc>, window_params = [{transform_indices = @transform_0, window_bounds = array<i64: 8, 128>}, {pipeline_mode = #tpu.pipeline_mode<synchronous>, transform_indices = @transform_1, window_bounds = array<i64: 3, 128, 128>}, {pipeline_mode = #tpu.pipeline_mode<synchronous>, transform_indices = @transform_2, window_bounds = array<i64: 3, 1, 128>}, {transform_indices = @transform_3, window_bounds = array<i64: 8, 128>}]} {
    %c0 = arith.constant 0 : index
    %c0_0 = arith.constant 0 : index
    %0 = vector.load %arg1[%c0, %c0_0] : memref<8x128xf32, #tpu.memory_space<vmem>>, vector<8x128xf32>
    %1 = arith.truncf %0 : vector<8x128xf32> to vector<8x128xbf16>
    %c0_1 = arith.constant 0 : index
    %c0_2 = arith.constant 0 : index
    %c0_3 = arith.constant 0 : index
    %2 = vector.load %arg2[%c0_1, %c0_2, %c0_3] : memref<3x128x128xbf16, #tpu.memory_space<vmem>>, vector<1x128x128xbf16>
    %3 = vector.shape_cast %2 : vector<1x128x128xbf16> to vector<128x128xbf16>
    %cst = arith.constant dense<0.000000e+00> : vector<8x128xf32>
    %4 = tpu.matmul %1, %3, %cst {dimension_numbers = #tpu.dot_dimension_numbers<[1], [0], [0], [1], [0, 0, 1, 1], [], []>} : vector<8x128xbf16>, vector<128x128xbf16>, vector<8x128xf32> -> vector<8x128xf32>
    %c0_4 = arith.constant 0 : index
    %c0_5 = arith.constant 0 : index
    %c0_6 = arith.constant 0 : index
    %5 = vector.load %arg3[%c0_4, %c0_5, %c0_6] : memref<3x1x128xf32, #tpu.memory_space<vmem>>, vector<1x1x128xf32>
    %6 = vector.shape_cast %5 : vector<1x1x128xf32> to vector<1x128xf32>
    %7 = vector.broadcast %6 : vector<1x128xf32> to vector<8x128xf32>
    %8 = arith.addf %4, %7 : vector<8x128xf32>
    %cst_7 = arith.constant 5.000000e-01 : f32
    %9 = vector.broadcast %cst_7 : f32 to vector<8x128xf32>
    %10 = arith.mulf %9, %8 : vector<8x128xf32>
    %cst_8 = arith.constant 0.707106769 : f32
    %11 = vector.broadcast %cst_8 : f32 to vector<8x128xf32>
    %12 = arith.mulf %8, %11 : vector<8x128xf32>
    %13 = math.erf %12 : vector<8x128xf32>
    %cst_9 = arith.constant 1.000000e+00 : f32
    %14 = vector.broadcast %cst_9 : f32 to vector<8x128xf32>
    %15 = arith.addf %14, %13 : vector<8x128xf32>
    %16 = arith.mulf %10, %15 : vector<8x128xf32>
    %17 = arith.truncf %16 : vector<8x128xf32> to vector<8x128xbf16>
    %c1 = arith.constant 1 : index
    %c0_10 = arith.constant 0 : index
    %c0_11 = arith.constant 0 : index
    %18 = vector.load %arg2[%c1, %c0_10, %c0_11] : memref<3x128x128xbf16, #tpu.memory_space<vmem>>, vector<1x128x128xbf16>
    %19 = vector.shape_cast %18 : vector<1x128x128xbf16> to vector<128x128xbf16>
    %cst_12 = arith.constant dense<0.000000e+00> : vector<8x128xf32>
    %20 = tpu.matmul %17, %19, %cst_12 {dimension_numbers = #tpu.dot_dimension_numbers<[1], [0], [0], [1], [0, 0, 1, 1], [], []>} : vector<8x128xbf16>, vector<128x128xbf16>, vector<8x128xf32> -> vector<8x128xf32>
    %c1_13 = arith.constant 1 : index
    %c0_14 = arith.constant 0 : index
    %c0_15 = arith.constant 0 : index
    %21 = vector.load %arg3[%c1_13, %c0_14, %c0_15] : memref<3x1x128xf32, #tpu.memory_space<vmem>>, vector<1x1x128xf32>
    %22 = vector.shape_cast %21 : vector<1x1x128xf32> to vector<1x128xf32>
    %23 = vector.broadcast %22 : vector<1x128xf32> to vector<8x128xf32>
    %24 = arith.addf %20, %23 : vector<8x128xf32>
    %cst_16 = arith.constant 5.000000e-01 : f32
    %25 = vector.broadcast %cst_16 : f32 to vector<8x128xf32>
    %26 = arith.mulf %25, %24 : vector<8x128xf32>
    %cst_17 = arith.constant 0.707106769 : f32
    %27 = vector.broadcast %cst_17 : f32 to vector<8x128xf32>
    %28 = arith.mulf %24, %27 : vector<8x128xf32>
    %29 = math.erf %28 : vector<8x128xf32>
    %cst_18 = arith.constant 1.000000e+00 : f32
    %30 = vector.broadcast %cst_18 : f32 to vector<8x128xf32>
    %31 = arith.addf %30, %29 : vector<8x128xf32>
    %32 = arith.mulf %26, %31 : vector<8x128xf32>
    %33 = arith.truncf %32 : vector<8x128xf32> to vector<8x128xbf16>
    %c2 = arith.constant 2 : index
    %c0_19 = arith.constant 0 : index
    %c0_20 = arith.constant 0 : index
    %34 = vector.load %arg2[%c2, %c0_19, %c0_20] : memref<3x128x128xbf16, #tpu.memory_space<vmem>>, vector<1x128x128xbf16>
    %35 = vector.shape_cast %34 : vector<1x128x128xbf16> to vector<128x128xbf16>
    %cst_21 = arith.constant dense<0.000000e+00> : vector<8x128xf32>
    %36 = tpu.matmul %33, %35, %cst_21 {dimension_numbers = #tpu.dot_dimension_numbers<[1], [0], [0], [1], [0, 0, 1, 1], [], []>} : vector<8x128xbf16>, vector<128x128xbf16>, vector<8x128xf32> -> vector<8x128xf32>
    %c2_22 = arith.constant 2 : index
    %c0_23 = arith.constant 0 : index
    %c0_24 = arith.constant 0 : index
    %37 = vector.load %arg3[%c2_22, %c0_23, %c0_24] : memref<3x1x128xf32, #tpu.memory_space<vmem>>, vector<1x1x128xf32>
    %38 = vector.shape_cast %37 : vector<1x1x128xf32> to vector<1x128xf32>
    %39 = vector.broadcast %38 : vector<1x128xf32> to vector<8x128xf32>
    %40 = arith.addf %36, %39 : vector<8x128xf32>
    %cst_25 = arith.constant 5.000000e-01 : f32
    %41 = vector.broadcast %cst_25 : f32 to vector<8x128xf32>
    %42 = arith.mulf %41, %40 : vector<8x128xf32>
    %cst_26 = arith.constant 0.707106769 : f32
    %43 = vector.broadcast %cst_26 : f32 to vector<8x128xf32>
    %44 = arith.mulf %40, %43 : vector<8x128xf32>
    %45 = math.erf %44 : vector<8x128xf32>
    %cst_27 = arith.constant 1.000000e+00 : f32
    %46 = vector.broadcast %cst_27 : f32 to vector<8x128xf32>
    %47 = arith.addf %46, %45 : vector<8x128xf32>
    %48 = arith.mulf %42, %47 : vector<8x128xf32>
    %c0_28 = arith.constant 0 : index
    %c0_29 = arith.constant 0 : index
    %49 = vector.load %arg4[%c0_28, %c0_29] : memref<8x128xf32, #tpu.memory_space<vmem>>, vector<8x128xf32>
    tpu.vector_store %arg4[%c0_28, %c0_29], %48 {strides = array<i32>} : memref<8x128xf32, #tpu.memory_space<vmem>>, vector<8x128xf32>,
    return
  }
  func.func @transform_0(%arg0: i32) -> (i32, i32) {
    %c0_i32 = arith.constant 0 : i32
    %c0_i32_0 = arith.constant 0 : i32
    return %arg0, %c0_i32 : i32, i32
  }
  func.func @transform_1(%arg0: i32) -> (i32, i32, i32) {
    %c0_i32 = arith.constant 0 : i32
    %c0_i32_0 = arith.constant 0 : i32
    %c0_i32_1 = arith.constant 0 : i32
    %c0_i32_2 = arith.constant 0 : i32
    return %c0_i32, %c0_i32_0, %c0_i32_1 : i32, i32, i32
  }
  func.func @transform_2(%arg0: i32) -> (i32, i32, i32) {
    %c0_i32 = arith.constant 0 : i32
    %c0_i32_0 = arith.constant 0 : i32
    %c0_i32_1 = arith.constant 0 : i32
    %c0_i32_2 = arith.constant 0 : i32
    return %c0_i32, %c0_i32_0, %c0_i32_1 : i32, i32, i32
  }
  func.func @transform_3(%arg0: i32) -> (i32, i32) {
    %c0_i32 = arith.constant 0 : i32
    %c0_i32_0 = arith.constant 0 : i32
    return %arg0, %c0_i32 : i32, i32
  }
}

</mosaic_0001>

<bundles_post_ra>
// kernel: tpu_custom_call.1
= control target key start
LH: loop header
LB: loop body
LE: loop exit
PB: predicated region body
PF: predicated region fallthrough
CT: control target
= control target key end

     0   :  { %8 = vsyncpa [#allocation3], 0  ;;  %s1225_s0 = inlined_call_operand.hbm [shape: f32[16,128], index: 0, kind: input, shape index: {}]   ;;  %s1226_s1 = inlined_call_operand.hbm [shape: bf16[3,128,128], index: 1, kind: input, shape index: {}]   ;;  %s1227_s2 = inlined_call_operand.vmem [shape: f32[3,1,128], index: 2, kind: input, shape index: {}]   ;;  %s1228_s3 = inlined_call_operand.hbm [shape: f32[16,128], index: 3, kind: output, shape index: {}]  }
   0x1   :  { %10 = vsyncpa [#allocation3 + $0x1], 0 }
   0x2   :  { %11 = vsyncpa [#allocation6], 0 }
   0x3   :  { %12 = vsyncpa [#allocation4], 0 }
   0x4   :  { %14 = vsyncpa [#allocation4 + $0x1], 0  ;;  %s1025_s12 = smov 0   ;;  %s1027_s13 = smov 0  }
   0x5   :  { %s1029_s14 = smov 0   ;;  %s1031_s15 = smov 0  }
   0x6 LB: > { %s1046_s16 = sadd.s32 4294967295, %s996_s15   ;;  %s653_s17 = sadd.s32 4294967294, %s996_s15   ;;  %s996_s15 = sphi %s1031_s15, %s1250_s15   ;;  %s992_s14 = sphi %s1029_s14, %s1249_s14   ;;  %s988_s13 = sphi %s1027_s13, %s1248_s13   ;;  %s984_s12 = sphi %s1025_s12, %s1247_s12  }
   0x7   : > { %p40_p0 = scmp.ne.s32.totalorder %s988_s13, %s984_s12  ;;  %p1229_p1 = scmp.eq.s32.totalorder %s1046_s16, 0 }
   0x8   : > { %p112_p3 = scmp.eq.s32.totalorder %s653_s17, 1  ;;  %p654_p5 = scmp.ge.s32.totalorder %s996_s15, 1 }
   0x9   : > { %p1055_p4 = por %p1229_p1, %p40_p0  ;;  %p119_p7 = scmp.lt.s32.totalorder %s996_s15, 3 }
   0xa   : > { %p1060_p6 = por %p112_p3, %p40_p0  ;;  %s998_s21 = smov [#allocation5]  }
   0xb   : > { %s1233_s18 = scalar_select %p1055_p4, 1, 0 }
   0xc   : > { %s1234_s19 = scalar_select %p1060_p6, 1, 0 }
   0xd   : > { %p1065_p8 = pnand %p654_p5, %p119_p7  ;;  %s131_s22 = sshll.u32 %s998_s21, 4  ;;  %s132_s22 = int_to_ptr.vmem [resolvable:$true] %s131_s22 }
   0xe   : > { %s1079_s24 = sadd.s32 1, %s996_s15   ;;  %s27_s25 = sadd.s32 1, %s992_s14 }
   0xf   : > { %s1235_s20 = scalar_select %p1065_p8, 1, 0 }
  0x10   : > { %p791_p9 = pneg %p1065_p8  ;;  %s24_s26 = ssub.s32 %s996_s15, %s1079_s24 }
  0x11   : > { %s885_s27 = scalar_lea.vmem %s132_s22, 3072  ;;  %p893_p5 = scmp.lt.s32.totalorder %s132_s22, %s132_s22 }
  0x12   : > { %p1074_p11 = pnand %p791_p9, %p1229_p1  ;;  %p886_p13 = scmp.ne.s32.totalorder %s132_s22, %s885_s27 }
  0x13   : > { %p894_p7 = scmp.lt.s32.totalorder %s885_s27, %s885_s27 }
  0x14   : > { %p876_p12 = pneg %p1074_p11 }
  0x15   : > { %p895_p10 = por %p894_p7, %p893_p5 }
  0x16   : > { %p888_p0 = pnand %p886_p13, %p876_p12 }
  0x18   : > { %p889_p3 = pneg %p888_p0 }
  0x1a   : > { %p896_p2 = pnand %p895_p10, %p889_p3 }
  0x1c   : > { %899 = shalt.err (!%p896_p2)
}
  0x1d   : > { %s999_s28 = smov 64   ;;  %s1000_s29 = smov 4  }
  0x1e   : > { %794 = dma.hbm_to_vmem [thread:$0]  (!%p1074_p11), %s1226_s1, 3072, %s132_s22, [#allocation6], %s999_s28, %s999_s28, %s1000_s29  }
  0x1f   : > { %p25_p9 = scmp.eq.s32.totalorder %s24_s26, 0  ;;  %p34_p12 = scmp.ne.s32.totalorder %s992_s14, %s988_s13 }
  0x20   : > { %p35_p10 = scmp.eq.s32.totalorder %s996_s15, 0  ;;  %p804_p2 = scmp.lt.s32.totalorder %s996_s15, 2 }
  0x21   : > { %s1096_s5 = scalar_select %p25_p9, %s992_s14, %s27_s25  }
  0x22   : > { %p36_p13 = por %p35_p10, %p34_p12  ;;  %p1237_p0 = scmp.eq.s32.totalorder %s1046_s16, 1 }
  0x23   : > { %s148_s7 = sand.u32 1, %s992_s14   ;;  %s658_s8 = sshll.u32 %s996_s15, 7 }
  0x24   : > { %p1100_p3 = por %p1237_p0, %p34_p12  ;;  %s657_s9 = sshll.u32 %s148_s7, 3 }
  0x25   : > { %s1109_s17 = scalar_lea.hbm %s1225_s0, %s658_s8  ;;  %s152_s21 = scalar_lea.vmem [#allocation2], %s657_s9 }
  0x26   : > { %s1238_s6 = scalar_select %p1100_p3, 1, 0 }
  0x27   : > { %s159_s22 = sshll.u32 %s152_s21, 4  ;;  %p1111_p11 = pnand %p804_p2, %p36_p13  ;;  %s160_s22 = int_to_ptr.vmem [resolvable:$true] %s159_s22 }
  0x28   : > { %s149_s25 = scalar_lea.sflag [#allocation3], %s148_s7  ;;  %s900_s26 = scalar_lea.hbm %s1109_s17, 128 }
  0x29   : > { %p901_p5 = scmp.ne.s32.totalorder %s1109_s17, %s900_s26  ;;  %p902_p7 = pneg %p1111_p11 }
  0x2a   : > { %s905_s29 = scalar_lea.hbm %s1225_s0, 256  ;;  %p906_p10 = scmp.lt.s32.totalorder %s1109_s17, %s1225_s0 }
  0x2b   : > { %p903_p9 = pnand %p902_p7, %p901_p5  ;;  %p907_p2 = scmp.lt.s32.totalorder %s905_s29, %s900_s26 }
  0x2d   : > { %p904_p12 = pneg %p903_p9  ;;  %p908_p13 = por %p907_p2, %p906_p10 }
  0x2f   : > { %p909_p0 = pnand %p908_p13, %p904_p12 }
  0x31   : > { %912 = shalt.err (!%p909_p0)
}
  0x32   : > { %s913_s8 = scalar_lea.vmem %s160_s22, 128  ;;  %s1001_s7 = smov [#allocation2]  }
  0x33   : > { %p914_p1 = scmp.ne.s32.totalorder %s160_s22, %s913_s8  ;;  %s918_s9 = sshll.u32 %s1001_s7, 4  ;;  %s919_s9 = int_to_ptr.vmem [resolvable:$false] %s918_s9 }
  0x34   : > { %s920_s10 = scalar_lea.vmem %s919_s9, 256  ;;  %p921_p5 = scmp.lt.s32.totalorder %s160_s22, %s919_s9 }
  0x35   : > { %p916_p6 = pnand %p914_p1, %p902_p7  ;;  %p922_p9 = scmp.lt.s32.totalorder %s920_s10, %s913_s8 }
  0x37   : > { %p917_p3 = pneg %p916_p6  ;;  %p923_p4 = por %p922_p9, %p921_p5 }
  0x39   : > { %p924_p8 = pnand %p923_p4, %p917_p3 }
  0x3b   : > { %927 = shalt.err (!%p924_p8)
}
  0x3c   : > { %798 = dma.hbm_to_vmem [thread:$0]  (!%p1111_p11), %s1109_s17, 128, %s160_s22, %s149_s25  }
  0x3d   : > { %p1240_p12 = scmp.ne.s32.totalorder %s1235_s20, 0 }
  0x3e   : > { %s1132_s11 = sand.u32 (!%p1240_p12), 1, %s988_s13   ;;  %p1241_p1 = scmp.ne.s32.totalorder (!%p1240_p12), %s1233_s18, 0 }
  0x3f   : > { %168 = sbr.rel (%p1240_p12) target bundleno = 768 (0x300), region = 32  ;;  %s660_s21 = sshll.u32 (!%p1240_p12), %s1132_s11, 3 }
  0x40   : > { %s171_s26 = scalar_lea.sflag (!%p1240_p12), [#allocation3], %s1132_s11  ;;  %s1138_s27 = scalar_lea.vmem (!%p1240_p12), [#allocation2], %s660_s21 }
  0x44   : > { %971 = dma.done.wait (%p1241_p1), %s171_s26, 128  }
  0x45   : > { %973 = vsyncadd (%p1241_p1), %s171_s26, 4294967168  ;;  %p1242_p4 = scmp.eq.s32.totalorder %s1046_s16, 0 }
  0x47   : > { %975 = dma.done.wait (%p1242_p4), [#allocation6], 3072   ;;  %p1243_p6 = pmov %p1242_p4 }
  0x48   : > { %v1002_v0 = vmov 0.0   ;;  %vm1003_vm0 = vmmov 0   ;;  %v844_v1 = vld [vmem:[#allocation5 + $0x38] sm:$0xff]   ;;  %v845_v2 = vld [vmem:[#allocation5 + $0x30] sm:$0xff]   ;;  %v846_v3 = vld [vmem:[#allocation5 + $0x28] sm:$0xff]   ;;  %s693_s28 = sshll.u32 %s1046_s16, 7 }
  0x49   : > { %977 = vsyncadd (%p1243_p6), [#allocation6], 4294964224  ;;  %723 = vmatprep.subr.bf16.mxu0 %v1002_v0  ;;  %739 = vmatprep.mubr.msk.bf16.mxu0 %vm1003_vm0, %v1002_v0  ;;  %v852_v4 = vld [vmem:[#allocation5 + $0x78] sm:$0xff]   ;;  %v847_v5 = vld [vmem:[#allocation5 + $0x20] sm:$0xff]   ;;  %s200_s29 = scalar_lea.vmem [#allocation7], %s660_s21  ;;  %s571_s7 = scalar_lea.hbm %s1228_s3, %s693_s28 }
  0x4a   : > { %743 = vmatprep.subr.bf16.mxu1 %v1002_v0  ;;  %759 = vmatprep.mubr.msk.bf16.mxu1 %vm1003_vm0, %v1002_v0  ;;  %v853_v6 = vld [vmem:[#allocation5 + $0x70] sm:$0xff]   ;;  %v848_v7 = vld [vmem:[#allocation5 + $0x18] sm:$0xff]   ;;  %v850_v9 = vld [vmem:[#allocation5 + $0x8] sm:$0xff]   ;;  %s573_s30 = sshll.u32 %s200_s29, 4  ;;  %s560_s9 = scalar_lea.sflag [#allocation4], %s1132_s11  ;;  %s574_s30 = int_to_ptr.vmem [resolvable:$true] %s573_s30 }
  0x4b   : > { %724 = vmatpush3.bf16.msra.mxu0 %v844_v1  ;;  %744 = vmatpush3.bf16.msra.mxu1 %v852_v4  ;;  %v849_v8 = vld [vmem:[#allocation5 + $0x10] sm:$0xff]   ;;  %v851_v10 = vld [vmem:[#allocation5] sm:$0xff]   ;;  %v854_v13 = vld [vmem:[#allocation5 + $0x68] sm:$0xff]   ;;  %s928_s10 = scalar_lea.vmem %s574_s30, 128  ;;  %p1244_p3 = scmp.ne.s32.totalorder %s1238_s6, 0 }
  0x4c   : > { %725 = vmatprep.subr.bf16.mxu0 %v1002_v0  ;;  %745 = vmatprep.subr.bf16.mxu1 %v1002_v0  ;;  %v202_v11 = vld [vmem:[%s1138_s27] sm:$0xff]  ;;  %v855_v14 = vld [vmem:[#allocation5 + $0x60] sm:$0xff]   ;;  %v858_v17 = vld [vmem:[#allocation5 + $0x48] sm:$0xff]   ;;  %p929_p8 = scmp.ne.s32.totalorder %s574_s30, %s928_s10  ;;  %s1004_s26 = smov [#allocation7]  }
  0x4d   : > { %v203_v12 = vpack.c.bf16 %v202_v11, %v202_v11  ;;  %v856_v15 = vld [vmem:[#allocation5 + $0x58] sm:$0xff]   ;;  %v857_v16 = vld [vmem:[#allocation5 + $0x50] sm:$0xff]   ;;  %v859_v18 = vld [vmem:[#allocation5 + $0x40] sm:$0xff]   ;;  %s932_s16 = sshll.u32 %s1004_s26, 4  ;;  %s933_s16 = int_to_ptr.vmem [resolvable:$false] %s932_s16 }
  0x4e   : > { %v860_v19 = vld [vmem:[#allocation5 + $0xb8] sm:$0xff]   ;;  %v861_v20 = vld [vmem:[#allocation5 + $0xb0] sm:$0xff]   ;;  %v862_v33 = vld [vmem:[#allocation5 + $0xa8] sm:$0xff]   ;;  %p930_p11 = pnand %p929_p8, %p1244_p3  ;;  %s934_s21 = scalar_lea.vmem %s933_s16, 256 }
  0x4f   : > { %726 = vmatpush3.bf16.msra.mxu0 %v845_v2  ;;  %746 = vmatpush3.bf16.msra.mxu1 %v853_v6  ;;  %v663_v21 = vld [vmem:[%s1227_s2] ss:$0 sm:$0xff]  ;;  %v863_v34 = vld [vmem:[#allocation5 + $0xa0] sm:$0xff]   ;;  %v864_v35 = vld [vmem:[#allocation5 + $0x98] sm:$0xff]   ;;  %p935_p10 = scmp.lt.s32.totalorder %s574_s30, %s933_s16  ;;  %p936_p2 = scmp.lt.s32.totalorder %s934_s21, %s928_s10 }
  0x50   : > { %727 = vmatprep.subr.bf16.mxu0 %v1002_v0  ;;  %747 = vmatprep.subr.bf16.mxu1 %v1002_v0  ;;  %v865_v36 = vld [vmem:[#allocation5 + $0x90] sm:$0xff]   ;;  %v866_v37 = vld [vmem:[#allocation5 + $0x88] sm:$0xff]   ;;  %v867_v38 = vld [vmem:[#allocation5 + $0x80] sm:$0xff]   ;;  %p931_p7 = pneg %p930_p11 }
  0x51   : > { %v673_v39 = vld [vmem:[%s1227_s2 + $0x1] ss:$0 sm:$0xff]  ;;  %v683_v51 = vld [vmem:[%s1227_s2 + $0x2] ss:$0 sm:$0xff]  ;;  %p937_p13 = por %p936_p2, %p935_p10 }
  0x53   : > { %728 = vmatpush3.bf16.msra.mxu0 %v846_v3  ;;  %748 = vmatpush3.bf16.msra.mxu1 %v854_v13  ;;  %p938_p0 = pnand %p937_p13, %p931_p7 }
  0x54   : > { %729 = vmatprep.subr.bf16.mxu0 %v1002_v0  ;;  %749 = vmatprep.subr.bf16.mxu1 %v1002_v0 }
  0x57   : > { %730 = vmatpush3.bf16.msra.mxu0 %v847_v5  ;;  %750 = vmatpush3.bf16.msra.mxu1 %v855_v14 }
  0x58   : > { %731 = vmatprep.subr.bf16.mxu0 %v1002_v0  ;;  %751 = vmatprep.subr.bf16.mxu1 %v1002_v0 }
  0x5b   : > { %732 = vmatpush3.bf16.msra.mxu0 %v848_v7  ;;  %752 = vmatpush3.bf16.msra.mxu1 %v856_v15 }
  0x5c   : > { %733 = vmatprep.subr.bf16.mxu0 %v1002_v0  ;;  %753 = vmatprep.subr.bf16.mxu1 %v1002_v0 }
  0x5f   : > { %734 = vmatpush3.bf16.msra.mxu0 %v849_v8  ;;  %754 = vmatpush3.bf16.msra.mxu1 %v857_v16 }
  0x60   : > { %735 = vmatprep.subr.bf16.mxu0 %v1002_v0  ;;  %755 = vmatprep.subr.bf16.mxu1 %v1002_v0 }
  0x63   : > { %736 = vmatpush3.bf16.msra.mxu0 %v850_v9  ;;  %756 = vmatpush3.bf16.msra.mxu1 %v858_v17 }
  0x64   : > { %737 = vmatprep.subr.bf16.mxu0 %v1002_v0  ;;  %757 = vmatprep.subr.bf16.mxu1 %v1002_v0 }
  0x67   : > { %738 = vmatpush3.bf16.msra.mxu0 %v851_v10  ;;  %758 = vmatpush3.bf16.msra.mxu1 %v859_v18 }
  0x68   : > { %763 = vmatprep.subr.bf16.mxu0 %v1002_v0 }
  0x6a   : > { %740 = vmatmul.mubr.bf16.vlgmr.msra.gmra.mxu0 %v203_v12 }
  0x6b   : > { %779 = vmatprep.mubr.msk.bf16.mxu0 %vm1003_vm0, %v1002_v0  ;;  %764 = vmatpush3.bf16.msra.mxu0 %v860_v19 }
  0x6c   : > { %765 = vmatprep.subr.bf16.mxu0 %v1002_v0 }
  0x6f   : > { %766 = vmatpush3.bf16.msra.mxu0 %v861_v20 }
  0x70   : > { %767 = vmatprep.subr.bf16.mxu0 %v1002_v0 }
  0x73   : > { %768 = vmatpush3.bf16.msra.mxu0 %v862_v33 }
  0x74   : > { %769 = vmatprep.subr.bf16.mxu0 %v1002_v0 }
  0x77   : > { %770 = vmatpush3.bf16.msra.mxu0 %v863_v34 }
  0x78   : > { %771 = vmatprep.subr.bf16.mxu0 %v1002_v0 }
  0x7b   : > { %772 = vmatpush3.bf16.msra.mxu0 %v864_v35 }
  0x7c   : > { %773 = vmatprep.subr.bf16.mxu0 %v1002_v0 }
  0x7f   : > { %774 = vmatpush3.bf16.msra.mxu0 %v865_v36 }
  0x80   : > { %775 = vmatprep.subr.bf16.mxu0 %v1002_v0 }
  0x83   : > { %776 = vmatpush3.bf16.msra.mxu0 %v866_v37 }
  0x84   : > { %777 = vmatprep.subr.bf16.mxu0 %v1002_v0 }
  0x87   : > { %778 = vmatpush3.bf16.msra.mxu0 %v867_v38 }
 0x12a   : > { %v309_v22 = vpop.f32.mrf.mxu0 }
 0x12b   : > { %v310_v23 = vadd.f32 %v663_v21, %v309_v22 }
 0x12c   : > { %v741_v24 = vpop.f32.mrf.mxu0 }
 0x12d   : > { %v316_v25 = vmul.f32 0.70710677, %v310_v23  ;;  %v315_v29 = vmul.f32 0.5, %v310_v23 }
 0x12e   : > { %v312_v26 = vpop.f32.mrf.mxu0 }
 0x12f   : > { %868 = verf.f32 %v316_v25 }
 0x130   : > { %v742_v27 = vpop.f32.mrf.mxu0 }
 0x13c   : > { %v869_v28 = vpop.eup %868 }
 0x13d   : > { %v318_v30 = vadd.f32 1.0, %v869_v28 }
 0x13f   : > { %v319_v31 = vmul.f32 %v318_v30, %v315_v29 }
 0x141   : > { %v320_v32 = vpack.c.bf16 %v319_v31, %v319_v31 }
 0x143   : > { %760 = vmatmul.mubr.bf16.vlgmr.msra.gmra.mxu1 %v320_v32 }
 0x203   : > { %v428_v40 = vpop.f32.mrf.mxu1 }
 0x204   : > { %v429_v41 = vadd.f32 %v673_v39, %v428_v40 }
 0x205   : > { %v761_v42 = vpop.f32.mrf.mxu1 }
 0x206   : > { %v435_v43 = vmul.f32 0.70710677, %v429_v41  ;;  %v434_v47 = vmul.f32 0.5, %v429_v41 }
 0x207   : > { %v431_v44 = vpop.f32.mrf.mxu1 }
 0x208   : > { %870 = verf.f32 %v435_v43 }
 0x209   : > { %v762_v45 = vpop.f32.mrf.mxu1 }
 0x215   : > { %v871_v46 = vpop.eup %870 }
 0x216   : > { %v437_v48 = vadd.f32 1.0, %v871_v46 }
 0x218   : > { %v438_v49 = vmul.f32 %v437_v48, %v434_v47 }
 0x21a   : > { %v439_v50 = vpack.c.bf16 %v438_v49, %v438_v49 }
 0x21c   : > { %780 = vmatmul.mubr.bf16.vlgmr.msra.gmra.mxu0 %v439_v50 }
 0x2dc   : > { %v547_v52 = vpop.f32.mrf.mxu0 }
 0x2dd   : > { %v548_v53 = vadd.f32 %v683_v51, %v547_v52 }
 0x2de   : > { %v781_v54 = vpop.f32.mrf.mxu0 }
 0x2df   : > { %v554_v55 = vmul.f32 0.70710677, %v548_v53  ;;  %v553_v59 = vmul.f32 0.5, %v548_v53 }
 0x2e0   : > { %v550_v56 = vpop.f32.mrf.mxu0 }
 0x2e1   : > { %872 = verf.f32 %v554_v55 }
 0x2e2   : > { %v782_v57 = vpop.f32.mrf.mxu0 }
 0x2ee   : > { %v873_v58 = vpop.eup %872 }
 0x2ef   : > { %v556_v60 = vadd.f32 1.0, %v873_v58 }
 0x2f1   : > { %v557_v61 = vmul.f32 %v556_v60, %v553_v59 }
 0x2f3   : > { %558 = vst [vmem:[%s200_s29] sm:$0xff] %v557_v61 }
 0x2f4   : > { %941 = shalt.err (!%p938_p0)
}
 0x2f5   : > { %s942_s27 = scalar_lea.hbm %s571_s7, 128  ;;  %s946_s20 = scalar_lea.hbm %s1228_s3, 256 }
 0x2f6   : > { %p943_p5 = scmp.ne.s32.totalorder %s571_s7, %s942_s27  ;;  %p947_p1 = scmp.lt.s32.totalorder %s571_s7, %s1228_s3 }
 0x2f7   : > { %p948_p4 = scmp.lt.s32.totalorder %s946_s20, %s942_s27 }
 0x2f8   : > { %p944_p9 = pnand %p943_p5, %p1244_p3 }
 0x2f9   : > { %p949_p6 = por %p948_p4, %p947_p1 }
 0x2fa   : > { %p945_p12 = pneg %p944_p9 }
 0x2fc   : > { %p950_p8 = pnand %p949_p6, %p945_p12 }
 0x2fe   : > { %953 = shalt.err (!%p950_p8)
}
 0x2ff   : > { %789 = dma.vmem_to_hbm [thread:$0]  (%p1244_p3), %s574_s30, 128, %s571_s7, %s560_s9  }
 0x300 PF: > { %s585_s23 = sand.u32 1, %s984_s12   ;;  %p1245_p11 = scmp.ne.s32.totalorder %s1234_s19, 0 }
 0x301   : > { %p1246_p7 = scmp.ge.s32.totalorder %s996_s15, 2  ;;  %s586_s25 = scalar_lea.sflag [#allocation4], %s585_s23 }
 0x303   : > { %p800_p10 = pnand %p1246_p7, %p1245_p11 }
 0x305   : > { %p801_p2 = pneg %p800_p10 }
 0x307   : > { %979 = dma.done.wait (%p801_p2), %s586_s25, 128  }
 0x308   : > { %981 = vsyncadd (%p801_p2), %s586_s25, 4294967168  ;;  %p17_p13 = scmp.ge.s32.totalorder %s1079_s24, 4   ;;  %s1247_s12 = smov %s988_s13 }
 0x309   : > { %s1248_s13 = smov %s992_s14  ;;  %s1249_s14 = smov %s1096_s5 }
 0x30a   : > { %s1250_s15 = smov %s1079_s24  ;;  %19 = sbr.rel (!%p17_p13) target bundleno = 6 (0x6), region = 85 }
 0x30f   :  { %591 = vsyncpa [#allocation3], 1 }
 0x310   :  { %593 = vsyncpa [#allocation3 + $0x1], 1 }
 0x311   :  { %594 = vsyncpa [#allocation6], 1 }
 0x312   :  { %595 = vsyncpa [#allocation4], 1 }
 0x313   :  { %597 = vsyncpa [#allocation4 + $0x1], 1 }

// kernel: tpu_custom_call.1
= control target key start
LH: loop header
LB: loop body
LE: loop exit
PB: predicated region body
PF: predicated region fallthrough
CT: control target
= control target key end

     0   :  { %8 = vsyncpa [#allocation3], 0  ;;  %s1225_s0 = inlined_call_operand.hbm [shape: f32[16,128], index: 0, kind: input, shape index: {}]   ;;  %s1226_s1 = inlined_call_operand.hbm [shape: bf16[3,128,128], index: 1, kind: input, shape index: {}]   ;;  %s1227_s2 = inlined_call_operand.vmem [shape: f32[3,1,128], index: 2, kind: input, shape index: {}]   ;;  %s1228_s3 = inlined_call_operand.hbm [shape: f32[16,128], index: 3, kind: output, shape index: {}]  }
   0x1   :  { %10 = vsyncpa [#allocation3 + $0x1], 0 }
   0x2   :  { %11 = vsyncpa [#allocation6], 0 }
   0x3   :  { %12 = vsyncpa [#allocation4], 0 }
   0x4   :  { %14 = vsyncpa [#allocation4 + $0x1], 0  ;;  %s1025_s12 = smov 0   ;;  %s1027_s13 = smov 0  }
   0x5   :  { %s1029_s14 = smov 0   ;;  %s1031_s15 = smov 0  }
   0x6 LB: > { %s1046_s16 = sadd.s32 4294967295, %s996_s15   ;;  %s653_s17 = sadd.s32 4294967294, %s996_s15   ;;  %s996_s15 = sphi %s1031_s15, %s1250_s15   ;;  %s992_s14 = sphi %s1029_s14, %s1249_s14   ;;  %s988_s13 = sphi %s1027_s13, %s1248_s13   ;;  %s984_s12 = sphi %s1025_s12, %s1247_s12  }
   0x7   : > { %p40_p0 = scmp.ne.s32.totalorder %s988_s13, %s984_s12  ;;  %p1229_p1 = scmp.eq.s32.totalorder %s1046_s16, 0 }
   0x8   : > { %p112_p3 = scmp.eq.s32.totalorder %s653_s17, 1  ;;  %p654_p5 = scmp.ge.s32.totalorder %s996_s15, 1 }
   0x9   : > { %p1055_p4 = por %p1229_p1, %p40_p0  ;;  %p119_p7 = scmp.lt.s32.totalorder %s996_s15, 3 }
   0xa   : > { %p1060_p6 = por %p112_p3, %p40_p0  ;;  %s998_s21 = smov [#allocation5]  }
   0xb   : > { %s1233_s18 = scalar_select %p1055_p4, 1, 0 }
   0xc   : > { %s1234_s19 = scalar_select %p1060_p6, 1, 0 }
   0xd   : > { %p1065_p8 = pnand %p654_p5, %p119_p7  ;;  %s131_s22 = sshll.u32 %s998_s21, 4  ;;  %s132_s22 = int_to_ptr.vmem [resolvable:$true] %s131_s22 }
   0xe   : > { %s1079_s24 = sadd.s32 1, %s996_s15   ;;  %s27_s25 = sadd.s32 1, %s992_s14 }
   0xf   : > { %s1235_s20 = scalar_select %p1065_p8, 1, 0 }
  0x10   : > { %p791_p9 = pneg %p1065_p8  ;;  %s24_s26 = ssub.s32 %s996_s15, %s1079_s24 }
  0x11   : > { %s885_s27 = scalar_lea.vmem %s132_s22, 3072  ;;  %p893_p5 = scmp.lt.s32.totalorder %s132_s22, %s132_s22 }
  0x12   : > { %p1074_p11 = pnand %p791_p9, %p1229_p1  ;;  %p886_p13 = scmp.ne.s32.totalorder %s132_s22, %s885_s27 }
  0x13   : > { %p894_p7 = scmp.lt.s32.totalorder %s885_s27, %s885_s27 }
  0x14   : > { %p876_p12 = pneg %p1074_p11 }
  0x15   : > { %p895_p10 = por %p894_p7, %p893_p5 }
  0x16   : > { %p888_p0 = pnand %p886_p13, %p876_p12 }
  0x18   : > { %p889_p3 = pneg %p888_p0 }
  0x1a   : > { %p896_p2 = pnand %p895_p10, %p889_p3 }
  0x1c   : > { %899 = shalt.err (!%p896_p2)
}
  0x1d   : > { %s999_s28 = smov 64   ;;  %s1000_s29 = smov 4  }
  0x1e   : > { %794 = dma.hbm_to_vmem [thread:$0]  (!%p1074_p11), %s1226_s1, 3072, %s132_s22, [#allocation6], %s999_s28, %s999_s28, %s1000_s29  }
  0x1f   : > { %p25_p9 = scmp.eq.s32.totalorder %s24_s26, 0  ;;  %p34_p12 = scmp.ne.s32.totalorder %s992_s14, %s988_s13 }
  0x20   : > { %p35_p10 = scmp.eq.s32.totalorder %s996_s15, 0  ;;  %p804_p2 = scmp.lt.s32.totalorder %s996_s15, 2 }
  0x21   : > { %s1096_s5 = scalar_select %p25_p9, %s992_s14, %s27_s25  }
  0x22   : > { %p36_p13 = por %p35_p10, %p34_p12  ;;  %p1237_p0 = scmp.eq.s32.totalorder %s1046_s16, 1 }
  0x23   : > { %s148_s7 = sand.u32 1, %s992_s14   ;;  %s658_s8 = sshll.u32 %s996_s15, 7 }
  0x24   : > { %p1100_p3 = por %p1237_p0, %p34_p12  ;;  %s657_s9 = sshll.u32 %s148_s7, 3 }
  0x25   : > { %s1109_s17 = scalar_lea.hbm %s1225_s0, %s658_s8  ;;  %s152_s21 = scalar_lea.vmem [#allocation2], %s657_s9 }
  0x26   : > { %s1238_s6 = scalar_select %p1100_p3, 1, 0 }
  0x27   : > { %s159_s22 = sshll.u32 %s152_s21, 4  ;;  %p1111_p11 = pnand %p804_p2, %p36_p13  ;;  %s160_s22 = int_to_ptr.vmem [resolvable:$true] %s159_s22 }
  0x28   : > { %s149_s25 = scalar_lea.sflag [#allocation3], %s148_s7  ;;  %s900_s26 = scalar_lea.hbm %s1109_s17, 128 }
  0x29   : > { %p901_p5 = scmp.ne.s32.totalorder %s1109_s17, %s900_s26  ;;  %p902_p7 = pneg %p1111_p11 }
  0x2a   : > { %s905_s29 = scalar_lea.hbm %s1225_s0, 256  ;;  %p906_p10 = scmp.lt.s32.totalorder %s1109_s17, %s1225_s0 }
  0x2b   : > { %p903_p9 = pnand %p902_p7, %p901_p5  ;;  %p907_p2 = scmp.lt.s32.totalorder %s905_s29, %s900_s26 }
  0x2d   : > { %p904_p12 = pneg %p903_p9  ;;  %p908_p13 = por %p907_p2, %p906_p10 }
  0x2f   : > { %p909_p0 = pnand %p908_p13, %p904_p12 }
  0x31   : > { %912 = shalt.err (!%p909_p0)
}
  0x32   : > { %s913_s8 = scalar_lea.vmem %s160_s22, 128  ;;  %s1001_s7 = smov [#allocation2]  }
  0x33   : > { %p914_p1 = scmp.ne.s32.totalorder %s160_s22, %s913_s8  ;;  %s918_s9 = sshll.u32 %s1001_s7, 4  ;;  %s919_s9 = int_to_ptr.vmem [resolvable:$false] %s918_s9 }
  0x34   : > { %s920_s10 = scalar_lea.vmem %s919_s9, 256  ;;  %p921_p5 = scmp.lt.s32.totalorder %s160_s22, %s919_s9 }
  0x35   : > { %p916_p6 = pnand %p914_p1, %p902_p7  ;;  %p922_p9 = scmp.lt.s32.totalorder %s920_s10, %s913_s8 }
  0x37   : > { %p917_p3 = pneg %p916_p6  ;;  %p923_p4 = por %p922_p9, %p921_p5 }
  0x39   : > { %p924_p8 = pnand %p923_p4, %p917_p3 }
  0x3b   : > { %927 = shalt.err (!%p924_p8)
}
  0x3c   : > { %798 = dma.hbm_to_vmem [thread:$0]  (!%p1111_p11), %s1109_s17, 128, %s160_s22, %s149_s25  }
  0x3d   : > { %p1240_p12 = scmp.ne.s32.totalorder %s1235_s20, 0 }
  0x3e   : > { %s1132_s11 = sand.u32 (!%p1240_p12), 1, %s988_s13   ;;  %p1241_p1 = scmp.ne.s32.totalorder (!%p1240_p12), %s1233_s18, 0 }
  0x3f   : > { %168 = sbr.rel (%p1240_p12) target bundleno = 768 (0x300), region = 32  ;;  %s660_s21 = sshll.u32 (!%p1240_p12), %s1132_s11, 3 }
  0x40   : > { %s171_s26 = scalar_lea.sflag (!%p1240_p12), [#allocation3], %s1132_s11  ;;  %s1138_s27 = scalar_lea.vmem (!%p1240_p12), [#allocation2], %s660_s21 }
  0x44   : > { %971 = dma.done.wait (%p1241_p1), %s171_s26, 128  }
  0x45   : > { %973 = vsyncadd (%p1241_p1), %s171_s26, 4294967168  ;;  %p1242_p4 = scmp.eq.s32.totalorder %s1046_s16, 0 }
  0x47   : > { %975 = dma.done.wait (%p1242_p4), [#allocation6], 3072   ;;  %p1243_p6 = pmov %p1242_p4 }
  0x48   : > { %v1002_v0 = vmov 0.0   ;;  %vm1003_vm0 = vmmov 0   ;;  %v844_v1 = vld [vmem:[#allocation5 + $0x38] sm:$0xff]   ;;  %v845_v2 = vld [vmem:[#allocation5 + $0x30] sm:$0xff]   ;;  %v846_v3 = vld [vmem:[#allocation5 + $0x28] sm:$0xff]   ;;  %s693_s28 = sshll.u32 %s1046_s16, 7 }
  0x49   : > { %977 = vsyncadd (%p1243_p6), [#allocation6], 4294964224  ;;  %723 = vmatprep.subr.bf16.mxu0 %v1002_v0  ;;  %739 = vmatprep.mubr.msk.bf16.mxu0 %vm1003_vm0, %v1002_v0  ;;  %v852_v4 = vld [vmem:[#allocation5 + $0x78] sm:$0xff]   ;;  %v847_v5 = vld [vmem:[#allocation5 + $0x20] sm:$0xff]   ;;  %s200_s29 = scalar_lea.vmem [#allocation7], %s660_s21  ;;  %s571_s7 = scalar_lea.hbm %s1228_s3, %s693_s28 }
  0x4a   : > { %743 = vmatprep.subr.bf16.mxu1 %v1002_v0  ;;  %759 = vmatprep.mubr.msk.bf16.mxu1 %vm1003_vm0, %v1002_v0  ;;  %v853_v6 = vld [vmem:[#allocation5 + $0x70] sm:$0xff]   ;;  %v848_v7 = vld [vmem:[#allocation5 + $0x18] sm:$0xff]   ;;  %v850_v9 = vld [vmem:[#allocation5 + $0x8] sm:$0xff]   ;;  %s573_s30 = sshll.u32 %s200_s29, 4  ;;  %s560_s9 = scalar_lea.sflag [#allocation4], %s1132_s11  ;;  %s574_s30 = int_to_ptr.vmem [resolvable:$true] %s573_s30 }
  0x4b   : > { %724 = vmatpush3.bf16.msra.mxu0 %v844_v1  ;;  %744 = vmatpush3.bf16.msra.mxu1 %v852_v4  ;;  %v849_v8 = vld [vmem:[#allocation5 + $0x10] sm:$0xff]   ;;  %v851_v10 = vld [vmem:[#allocation5] sm:$0xff]   ;;  %v854_v13 = vld [vmem:[#allocation5 + $0x68] sm:$0xff]   ;;  %s928_s10 = scalar_lea.vmem %s574_s30, 128  ;;  %p1244_p3 = scmp.ne.s32.totalorder %s1238_s6, 0 }
  0x4c   : > { %725 = vmatprep.subr.bf16.mxu0 %v1002_v0  ;;  %745 = vmatprep.subr.bf16.mxu1 %v1002_v0  ;;  %v202_v11 = vld [vmem:[%s1138_s27] sm:$0xff]  ;;  %v855_v14 = vld [vmem:[#allocation5 + $0x60] sm:$0xff]   ;;  %v858_v17 = vld [vmem:[#allocation5 + $0x48] sm:$0xff]   ;;  %p929_p8 = scmp.ne.s32.totalorder %s574_s30, %s928_s10  ;;  %s1004_s26 = smov [#allocation7]  }
  0x4d   : > { %v203_v12 = vpack.c.bf16 %v202_v11, %v202_v11  ;;  %v856_v15 = vld [vmem:[#allocation5 + $0x58] sm:$0xff]   ;;  %v857_v16 = vld [vmem:[#allocation5 + $0x50] sm:$0xff]   ;;  %v859_v18 = vld [vmem:[#allocation5 + $0x40] sm:$0xff]   ;;  %s932_s16 = sshll.u32 %s1004_s26, 4  ;;  %s933_s16 = int_to_ptr.vmem [resolvable:$false] %s932_s16 }
  0x4e   : > { %v860_v19 = vld [vmem:[#allocation5 + $0xb8] sm:$0xff]   ;;  %v861_v20 = vld [vmem:[#allocation5 + $0xb0] sm:$0xff]   ;;  %v862_v33 = vld [vmem:[#allocation5 + $0xa8] sm:$0xff]   ;;  %p930_p11 = pnand %p929_p8, %p1244_p3  ;;  %s934_s21 = scalar_lea.vmem %s933_s16, 256 }
  0x4f   : > { %726 = vmatpush3.bf16.msra.mxu0 %v845_v2  ;;  %746 = vmatpush3.bf16.msra.mxu1 %v853_v6  ;;  %v663_v21 = vld [vmem:[%s1227_s2] ss:$0 sm:$0xff]  ;;  %v863_v34 = vld [vmem:[#allocation5 + $0xa0] sm:$0xff]   ;;  %v864_v35 = vld [vmem:[#allocation5 + $0x98] sm:$0xff]   ;;  %p935_p10 = scmp.lt.s32.totalorder %s574_s30, %s933_s16  ;;  %p936_p2 = scmp.lt.s32.totalorder %s934_s21, %s928_s10 }
  0x50   : > { %727 = vmatprep.subr.bf16.mxu0 %v1002_v0  ;;  %747 = vmatprep.subr.bf16.mxu1 %v1002_v0  ;;  %v865_v36 = vld [vmem:[#allocation5 + $0x90] sm:$0xff]   ;;  %v866_v37 = vld [vmem:[#allocation5 + $0x88] sm:$0xff]   ;;  %v867_v38 = vld [vmem:[#allocation5 + $0x80] sm:$0xff]   ;;  %p931_p7 = pneg %p930_p11 }
  0x51   : > { %v673_v39 = vld [vmem:[%s1227_s2 + $0x1] ss:$0 sm:$0xff]  ;;  %v683_v51 = vld [vmem:[%s1227_s2 + $0x2] ss:$0 sm:$0xff]  ;;  %p937_p13 = por %p936_p2, %p935_p10 }
  0x53   : > { %728 = vmatpush3.bf16.msra.mxu0 %v846_v3  ;;  %748 = vmatpush3.bf16.msra.mxu1 %v854_v13  ;;  %p938_p0 = pnand %p937_p13, %p931_p7 }
  0x54   : > { %729 = vmatprep.subr.bf16.mxu0 %v1002_v0  ;;  %749 = vmatprep.subr.bf16.mxu1 %v1002_v0 }
  0x57   : > { %730 = vmatpush3.bf16.msra.mxu0 %v847_v5  ;;  %750 = vmatpush3.bf16.msra.mxu1 %v855_v14 }
  0x58   : > { %731 = vmatprep.subr.bf16.mxu0 %v1002_v0  ;;  %751 = vmatprep.subr.bf16.mxu1 %v1002_v0 }
  0x5b   : > { %732 = vmatpush3.bf16.msra.mxu0 %v848_v7  ;;  %752 = vmatpush3.bf16.msra.mxu1 %v856_v15 }
  0x5c   : > { %733 = vmatprep.subr.bf16.mxu0 %v1002_v0  ;;  %753 = vmatprep.subr.bf16.mxu1 %v1002_v0 }
  0x5f   : > { %734 = vmatpush3.bf16.msra.mxu0 %v849_v8  ;;  %754 = vmatpush3.bf16.msra.mxu1 %v857_v16 }
  0x60   : > { %735 = vmatprep.subr.bf16.mxu0 %v1002_v0  ;;  %755 = vmatprep.subr.bf16.mxu1 %v1002_v0 }
  0x63   : > { %736 = vmatpush3.bf16.msra.mxu0 %v850_v9  ;;  %756 = vmatpush3.bf16.msra.mxu1 %v858_v17 }
  0x64   : > { %737 = vmatprep.subr.bf16.mxu0 %v1002_v0  ;;  %757 = vmatprep.subr.bf16.mxu1 %v1002_v0 }
  0x67   : > { %738 = vmatpush3.bf16.msra.mxu0 %v851_v10  ;;  %758 = vmatpush3.bf16.msra.mxu1 %v859_v18 }
  0x68   : > { %763 = vmatprep.subr.bf16.mxu0 %v1002_v0 }
  0x6a   : > { %740 = vmatmul.mubr.bf16.vlgmr.msra.gmra.mxu0 %v203_v12 }
  0x6b   : > { %779 = vmatprep.mubr.msk.bf16.mxu0 %vm1003_vm0, %v1002_v0  ;;  %764 = vmatpush3.bf16.msra.mxu0 %v860_v19 }
  0x6c   : > { %765 = vmatprep.subr.bf16.mxu0 %v1002_v0 }
  0x6f   : > { %766 = vmatpush3.bf16.msra.mxu0 %v861_v20 }
  0x70   : > { %767 = vmatprep.subr.bf16.mxu0 %v1002_v0 }
  0x73   : > { %768 = vmatpush3.bf16.msra.mxu0 %v862_v33 }
  0x74   : > { %769 = vmatprep.subr.bf16.mxu0 %v1002_v0 }
  0x77   : > { %770 = vmatpush3.bf16.msra.mxu0 %v863_v34 }
  0x78   : > { %771 = vmatprep.subr.bf16.mxu0 %v1002_v0 }
  0x7b   : > { %772 = vmatpush3.bf16.msra.mxu0 %v864_v35 }
  0x7c   : > { %773 = vmatprep.subr.bf16.mxu0 %v1002_v0 }
  0x7f   : > { %774 = vmatpush3.bf16.msra.mxu0 %v865_v36 }
  0x80   : > { %775 = vmatprep.subr.bf16.mxu0 %v1002_v0 }
  0x83   : > { %776 = vmatpush3.bf16.msra.mxu0 %v866_v37 }
  0x84   : > { %777 = vmatprep.subr.bf16.mxu0 %v1002_v0 }
  0x87   : > { %778 = vmatpush3.bf16.msra.mxu0 %v867_v38 }
 0x12a   : > { %v309_v22 = vpop.f32.mrf.mxu0 }
 0x12b   : > { %v310_v23 = vadd.f32 %v663_v21, %v309_v22 }
 0x12c   : > { %v741_v24 = vpop.f32.mrf.mxu0 }
 0x12d   : > { %v316_v25 = vmul.f32 0.70710677, %v310_v23  ;;  %v315_v29 = vmul.f32 0.5, %v310_v23 }
 0x12e   : > { %v312_v26 = vpop.f32.mrf.mxu0 }
 0x12f   : > { %868 = verf.f32 %v316_v25 }
 0x130   : > { %v742_v27 = vpop.f32.mrf.mxu0 }
 0x13c   : > { %v869_v28 = vpop.eup %868 }
 0x13d   : > { %v318_v30 = vadd.f32 1.0, %v869_v28 }
 0x13f   : > { %v319_v31 = vmul.f32 %v318_v30, %v315_v29 }
 0x141   : > { %v320_v32 = vpack.c.bf16 %v319_v31, %v319_v31 }
 0x143   : > { %760 = vmatmul.mubr.bf16.vlgmr.msra.gmra.mxu1 %v320_v32 }
 0x203   : > { %v428_v40 = vpop.f32.mrf.mxu1 }
 0x204   : > { %v429_v41 = vadd.f32 %v673_v39, %v428_v40 }
 0x205   : > { %v761_v42 = vpop.f32.mrf.mxu1 }
 0x206   : > { %v435_v43 = vmul.f32 0.70710677, %v429_v41  ;;  %v434_v47 = vmul.f32 0.5, %v429_v41 }
 0x207   : > { %v431_v44 = vpop.f32.mrf.mxu1 }
 0x208   : > { %870 = verf.f32 %v435_v43 }
 0x209   : > { %v762_v45 = vpop.f32.mrf.mxu1 }
 0x215   : > { %v871_v46 = vpop.eup %870 }
 0x216   : > { %v437_v48 = vadd.f32 1.0, %v871_v46 }
 0x218   : > { %v438_v49 = vmul.f32 %v437_v48, %v434_v47 }
 0x21a   : > { %v439_v50 = vpack.c.bf16 %v438_v49, %v438_v49 }
 0x21c   : > { %780 = vmatmul.mubr.bf16.vlgmr.msra.gmra.mxu0 %v439_v50 }
 0x2dc   : > { %v547_v52 = vpop.f32.mrf.mxu0 }
 0x2dd   : > { %v548_v53 = vadd.f32 %v683_v51, %v547_v52 }
 0x2de   : > { %v781_v54 = vpop.f32.mrf.mxu0 }
 0x2df   : > { %v554_v55 = vmul.f32 0.70710677, %v548_v53  ;;  %v553_v59 = vmul.f32 0.5, %v548_v53 }
 0x2e0   : > { %v550_v56 = vpop.f32.mrf.mxu0 }
 0x2e1   : > { %872 = verf.f32 %v554_v55 }
 0x2e2   : > { %v782_v57 = vpop.f32.mrf.mxu0 }
 0x2ee   : > { %v873_v58 = vpop.eup %872 }
 0x2ef   : > { %v556_v60 = vadd.f32 1.0, %v873_v58 }
 0x2f1   : > { %v557_v61 = vmul.f32 %v556_v60, %v553_v59 }
 0x2f3   : > { %558 = vst [vmem:[%s200_s29] sm:$0xff] %v557_v61 }
 0x2f4   : > { %941 = shalt.err (!%p938_p0)
}
 0x2f5   : > { %s942_s27 = scalar_lea.hbm %s571_s7, 128  ;;  %s946_s20 = scalar_lea.hbm %s1228_s3, 256 }
 0x2f6   : > { %p943_p5 = scmp.ne.s32.totalorder %s571_s7, %s942_s27  ;;  %p947_p1 = scmp.lt.s32.totalorder %s571_s7, %s1228_s3 }
 0x2f7   : > { %p948_p4 = scmp.lt.s32.totalorder %s946_s20, %s942_s27 }
 0x2f8   : > { %p944_p9 = pnand %p943_p5, %p1244_p3 }
 0x2f9   : > { %p949_p6 = por %p948_p4, %p947_p1 }
 0x2fa   : > { %p945_p12 = pneg %p944_p9 }
 0x2fc   : > { %p950_p8 = pnand %p949_p6, %p945_p12 }
 0x2fe   : > { %953 = shalt.err (!%p950_p8)
}
 0x2ff   : > { %789 = dma.vmem_to_hbm [thread:$0]  (%p1244_p3), %s574_s30, 128, %s571_s7, %s560_s9  }
 0x300 PF: > { %s585_s23 = sand.u32 1, %s984_s12   ;;  %p1245_p11 = scmp.ne.s32.totalorder %s1234_s19, 0 }
 0x301   : > { %p1246_p7 = scmp.ge.s32.totalorder %s996_s15, 2  ;;  %s586_s25 = scalar_lea.sflag [#allocation4], %s585_s23 }
 0x303   : > { %p800_p10 = pnand %p1246_p7, %p1245_p11 }
 0x305   : > { %p801_p2 = pneg %p800_p10 }
 0x307   : > { %979 = dma.done.wait (%p801_p2), %s586_s25, 128  }
 0x308   : > { %981 = vsyncadd (%p801_p2), %s586_s25, 4294967168  ;;  %p17_p13 = scmp.ge.s32.totalorder %s1079_s24, 4   ;;  %s1247_s12 = smov %s988_s13 }
 0x309   : > { %s1248_s13 = smov %s992_s14  ;;  %s1249_s14 = smov %s1096_s5 }
 0x30a   : > { %s1250_s15 = smov %s1079_s24  ;;  %19 = sbr.rel (!%p17_p13) target bundleno = 6 (0x6), region = 85 }
 0x30f   :  { %591 = vsyncpa [#allocation3], 1 }
 0x310   :  { %593 = vsyncpa [#allocation3 + $0x1], 1 }
 0x311   :  { %594 = vsyncpa [#allocation6], 1 }
 0x312   :  { %595 = vsyncpa [#allocation4], 1 }
 0x313   :  { %597 = vsyncpa [#allocation4 + $0x1], 1 }

</bundles_post_ra>
